<compile_context>
chip_gen: v6e
topology: v6e:2x2x1
jax: 0.10.0
libtpu: 0.0.40
codegen_flags: <defaults>
</compile_context>

<pallas_src>
import math
import jax
import jax.numpy as jnp
from jax.experimental import pallas as pl
from jax.experimental.pallas import tpu as pltpu


def _build_pe(max_len: int, d_model: int) -> jnp.ndarray:
    """Standard sin/cos positional-encoding buffer, shape (max_len, d_model), f32."""
    position = jnp.arange(0, max_len, dtype=jnp.float32)[:, None]             # (L, 1)
    div_term = jnp.exp(
        jnp.arange(0, d_model, 2, dtype=jnp.float32) * (-math.log(10000.0) / d_model)
    )                                                                           # (D/2,)
    angles = position * div_term                                                # (L, D/2)
    pe = jnp.zeros((max_len, d_model), dtype=jnp.float32)
    pe = pe.at[:, 0::2].set(jnp.sin(angles))
    pe = pe.at[:, 1::2].set(jnp.cos(angles))
    return pe


# ------------------------------ kernel body ------------------------------ #
def _pe_add_kernel(x_ref, pe_ref, o_ref):
    # 3D path: x_ref (TS, D), pe_ref (TS, D)        (batch dim squeezed away)
    # 2D path: x_ref (B, TL), pe_ref (1, TL)        (sublane broadcast)
    o_ref[...] = (x_ref[...].astype(jnp.float32) + pe_ref[...]).astype(o_ref.dtype)


# ------------------------------- wrapper ---------------------------------- #
_TARGET_TILE_BYTES = 2 * 1024 * 1024  # ~2 MiB per streamed tile


def _sublane_pack(itemsize: int) -> int:
    return {4: 8, 2: 16, 1: 32}.get(itemsize, 8)


def _vmem_limit(needed_bytes: int) -> int:
    # needed tiles + 4 MiB slack, clamped to [16 MiB, 48 MiB] (safe on v7x's 64 MiB).
    return int(min(48 << 20, max(needed_bytes + (4 << 20), 16 << 20)))


def positional_encoding_forward(x: jnp.ndarray, pe_full: jnp.ndarray) -> jnp.ndarray:
    """Adds positional encodings to x of shape (B, S, D). Dropout = identity (eval)."""
    if x.ndim != 3:
        raise ValueError(f"Expected 3D input tensor, got {x.ndim}D")
    B, S, D = x.shape
    if D != pe_full.shape[1]:
        raise ValueError(
            f"Input feature dim {D} doesn't match positional encoding dim {pe_full.shape[1]}"
        )
    if S > pe_full.shape[0]:
        raise ValueError(
            f"Input sequence length {S} exceeds maximum length {pe_full.shape[0]}"
        )

    in_itemsize = jnp.dtype(x.dtype).itemsize
    out_dtype = jnp.result_type(x.dtype, pe_full.dtype)   # torch promotion: bf16 + f32 -> f32
    out_itemsize = jnp.dtype(out_dtype).itemsize
    pe_slice = pe_full[:S, :]  # keep f32; add happens in f32 inside the kernel

    if D < 128:
        # ---------------- lane-dense path: flatten (S, D) -> S*D ---------------- #
        L = S * D
        x2 = x.reshape(B, L)
        pe2 = pe_slice.reshape(1, L)

        tl = max(128, (_TARGET_TILE_BYTES // max(1, B * in_itemsize)) // 128 * 128)
        if tl >= L:
            tl = L  # full-extent block is always layout-legal
        grid = (pl.cdiv(L, tl),)

        x_tile = B * tl * in_itemsize
        o_tile = B * tl * out_itemsize
        pe_tile = tl * 4
        vmem_limit = _vmem_limit(2 * x_tile + 2 * o_tile + 2 * pe_tile)

        out2 = pl.pallas_call(
            _pe_add_kernel,
            out_shape=jax.ShapeDtypeStruct((B, L), out_dtype),
            grid_spec=pltpu.PrefetchScalarGridSpec(
                num_scalar_prefetch=0,
                grid=grid,
                in_specs=[
                    pl.BlockSpec((B, tl), lambda l: (0, l)),   # x: full batch, lane tile
                    pl.BlockSpec((1, tl), lambda l: (0, l)),   # pe row (sublane-broadcast)
                ],
                out_specs=pl.BlockSpec((B, tl), lambda l: (0, l)),
            ),
            compiler_params=pltpu.CompilerParams(
                dimension_semantics=("parallel",),
                vmem_limit_bytes=vmem_limit,
            ),
        )(x2, pe2)
        return out2.reshape(B, S, D)

    # ---------------- general path: tile the sequence axis ---------------- #
    pack = _sublane_pack(in_itemsize)
    ts = max(pack, (_TARGET_TILE_BYTES // (D * in_itemsize)) // pack * pack)
    if ts >= S:
        ts = S  # full-extent block is always layout-legal

    # Batch innermost so the pe block index is unchanged between consecutive
    # steps -> Pallas skips re-DMA of the pe tile across the batch loop.
    grid = (pl.cdiv(S, ts), B)

    x_tile = ts * D * in_itemsize
    o_tile = ts * D * out_itemsize
    pe_tile = ts * D * 4
    vmem_limit = _vmem_limit(2 * x_tile + 2 * o_tile + 2 * pe_tile)

    return pl.pallas_call(
        _pe_add_kernel,
        out_shape=jax.ShapeDtypeStruct((B, S, D), out_dtype),
        grid_spec=pltpu.PrefetchScalarGridSpec(
            num_scalar_prefetch=0,
            grid=grid,
            in_specs=[
                # batch dim squeezed out of the kernel ref (no in-kernel broadcast)
                pl.BlockSpec((None, ts, D), lambda si, b: (b, si, 0)),
                pl.BlockSpec((ts, D), lambda si, b: (si, 0)),
            ],
            out_specs=pl.BlockSpec((None, ts, D), lambda si, b: (b, si, 0)),
        ),
        compiler_params=pltpu.CompilerParams(
            dimension_semantics=("parallel", "parallel"),  # v7x: shard both axes over TCs
            vmem_limit_bytes=vmem_limit,
        ),
    )(x, pe_slice)


if __name__ == "__main__":
    MAX_LEN = 64  # stands in for max_len=5000 at small scale
    key = jax.random.PRNGKey(0)
    k1, k2 = jax.random.split(key)

    # Path 1: lane-dense path (d_model < 128), shapes from the module's forward.
    B, S, D = 2, 8, 32
    x = jax.random.normal(k1, (B, S, D), dtype=jnp.float32)
    pe_full = _build_pe(MAX_LEN, D)
    out = jax.block_until_ready(positional_encoding_forward(x, pe_full))
    ref = x + pe_full[None, :S, :]
    assert out.shape == (B, S, D)
    assert out.dtype == ref.dtype
    assert jnp.allclose(out, ref, atol=1e-6), "mismatch vs reference (lane-dense path)"

    # Path 2: sequence-tiled path (d_model >= 128) with squeezed batch blocks.
    B2, S2, D2 = 2, 24, 128
    x2 = jax.random.normal(k2, (B2, S2, D2), dtype=jnp.float32)
    pe_full2 = _build_pe(MAX_LEN, D2)
    out2 = jax.block_until_ready(positional_encoding_forward(x2, pe_full2))
    ref2 = x2 + pe_full2[None, :S2, :]
    assert out2.shape == (B2, S2, D2)
    assert out2.dtype == ref2.dtype
    assert jnp.allclose(out2, ref2, atol=1e-6), "mismatch vs reference (tiled path)"

    print("KERNEL_OK")
</pallas_src>

<mosaic_0001>
module attributes {stable_mosaic.version = 11 : i64} {
  func.func @_pe_add_kernel(%arg0: i32, %arg1: memref<2x256xf32, #tpu.memory_space<vmem>>, %arg2: memref<1x256xf32, #tpu.memory_space<vmem>>, %arg3: memref<2x256xf32, #tpu.memory_space<vmem>>) attributes {dimension_semantics = [#tpu.dimension_semantics<parallel>], iteration_bounds = array<i64: 1>, scalar_prefetch = 0 : i64, scratch_operands = 0 : i64, tpu.core_type = #tpu.core_type<tc>, window_params = [{transform_indices = @transform_0, window_bounds = array<i64: 2, 256>}, {transform_indices = @transform_1, window_bounds = array<i64: 1, 256>}, {transform_indices = @transform_2, window_bounds = array<i64: 2, 256>}]} {
    %c0 = arith.constant 0 : index
    %c0_0 = arith.constant 0 : index
    %0 = vector.load %arg1[%c0, %c0_0] : memref<2x256xf32, #tpu.memory_space<vmem>>, vector<2x256xf32>
    %c0_1 = arith.constant 0 : index
    %c0_2 = arith.constant 0 : index
    %1 = vector.load %arg2[%c0_1, %c0_2] : memref<1x256xf32, #tpu.memory_space<vmem>>, vector<1x256xf32>
    %2 = vector.broadcast %1 : vector<1x256xf32> to vector<2x256xf32>
    %3 = arith.addf %0, %2 : vector<2x256xf32>
    %c0_3 = arith.constant 0 : index
    %c0_4 = arith.constant 0 : index
    %4 = vector.load %arg3[%c0_3, %c0_4] : memref<2x256xf32, #tpu.memory_space<vmem>>, vector<2x256xf32>
    tpu.vector_store %arg3[%c0_3, %c0_4], %3 {strides = array<i32>} : memref<2x256xf32, #tpu.memory_space<vmem>>, vector<2x256xf32>,
    return
  }
  func.func @transform_0(%arg0: i32) -> (i32, i32) {
    %c0_i32 = arith.constant 0 : i32
    %c0_i32_0 = arith.constant 0 : i32
    return %c0_i32, %arg0 : i32, i32
  }
  func.func @transform_1(%arg0: i32) -> (i32, i32) {
    %c0_i32 = arith.constant 0 : i32
    %c0_i32_0 = arith.constant 0 : i32
    return %c0_i32, %arg0 : i32, i32
  }
  func.func @transform_2(%arg0: i32) -> (i32, i32) {
    %c0_i32 = arith.constant 0 : i32
    %c0_i32_0 = arith.constant 0 : i32
    return %c0_i32, %arg0 : i32, i32
  }
}

</mosaic_0001>

<bundles_post_ra>
// kernel: tpu_custom_call.1
= control target key start
LH: loop header
LB: loop body
LE: loop exit
PB: predicated region body
PF: predicated region fallthrough
CT: control target
= control target key end

     0   :  { %7 = vsyncpa [#allocation3], 0  ;;  %s172_s0 = inlined_call_operand.hbm [shape: f32[2,256], index: 0, kind: input, shape index: {}]   ;;  %s173_s1 = inlined_call_operand.hbm [shape: f32[1,256], index: 1, kind: input, shape index: {}]   ;;  %s174_s2 = inlined_call_operand.hbm [shape: f32[2,256], index: 2, kind: output, shape index: {}]  }
   0x1   :  { %8 = vsyncpa [#allocation6], 0 }
   0x2   :  { %9 = vsyncpa [#allocation4], 0  ;;  %s144_s9 = smov [#allocation2]   ;;  %s145_s11 = smov [#allocation5]  }
   0x3   :  { %s16_s10 = sshll.u32 %s144_s9, 4  ;;  %s26_s12 = sshll.u32 %s145_s11, 4  ;;  %s17_s10 = int_to_ptr.vmem [resolvable:$true] %s16_s10  ;;  %s27_s12 = int_to_ptr.vmem [resolvable:$true] %s26_s12 }
   0x4   :  { %s86_s13 = scalar_lea.vmem %s17_s10, 64  ;;  %p91_p1 = scmp.lt.s32.totalorder %s17_s10, %s17_s10 }
   0x5   :  { %p87_p0 = scmp.ne.s32.totalorder %s17_s10, %s86_s13  ;;  %p92_p2 = scmp.lt.s32.totalorder %s86_s13, %s86_s13 }
   0x7   :  { %p93_p3 = por %p92_p2, %p91_p1 }
   0x9   :  { %p94_p4 = pnand %p93_p3, %p87_p0 }
   0xb   :  { %97 = shalt.err (!%p94_p4)
}
   0xc   :  { %19 = dma.hbm_to_vmem [thread:$0]  %s172_s0, 64, %s17_s10, [#allocation3]  }
   0xd   :  { %s106_s16 = scalar_lea.vmem %s27_s12, 32  ;;  %p111_p6 = scmp.lt.s32.totalorder %s27_s12, %s27_s12 }
   0xe   :  { %p107_p5 = scmp.ne.s32.totalorder %s27_s12, %s106_s16  ;;  %p112_p7 = scmp.lt.s32.totalorder %s106_s16, %s106_s16 }
  0x10   :  { %p113_p8 = por %p112_p7, %p111_p6 }
  0x12   :  { %p114_p9 = pnand %p113_p8, %p107_p5 }
  0x14   :  { %117 = shalt.err (!%p114_p9)
}
  0x15   :  { %29 = dma.hbm_to_vmem [thread:$0]  %s173_s1, 32, %s27_s12, [#allocation6]  }
  0x16   :  { %138 = dma.done.wait [#allocation3], 64  }
  0x17   :  { %139 = vsyncadd [#allocation3], 4294967232 }
  0x18   :  { %140 = dma.done.wait [#allocation6], 32  }
  0x19   :  { %141 = vsyncadd [#allocation6], 4294967264  ;;  %v39_v0 = vlaneseq  ;;  %v146_v1 = vmov 1983009808   ;;  %v37_v7 = vld [vmem:[#allocation5] sm:$0x3] }
  0x1a   :  { %v49_v2 = vunpack.c.l.s4 %v146_v1  ;;  %v36_v12 = vld [vmem:[#allocation2] sm:$0xf]  ;;  %s147_s0 = smov [#allocation7]  }
  0x1b   :  { %v40_v3 = vshrl.u32 %v39_v0, 7  ;;  %s64_s19 = sshll.u32 %s147_s0, 4  ;;  %s65_s19 = int_to_ptr.vmem [resolvable:$true] %s64_s19 }
  0x1c   :  { %v50_v6 = vunpack.c.0.s8 %v49_v2  ;;  %s118_s1 = scalar_lea.vmem %s65_s19, 64  ;;  %p123_p11 = scmp.lt.s32.totalorder %s65_s19, %s65_s19 }
  0x1d   :  { %v41_v4 = vsub.s32 0, %v40_v3  ;;  %v45_v5 = vsub.s32 1, %v40_v3  ;;  %p119_p10 = scmp.ne.s32.totalorder %s65_s19, %s118_s1  ;;  %p124_p12 = scmp.lt.s32.totalorder %s118_s1, %s118_s1 }
  0x1e   :  { %v53_v10 = vsub.s32 %v50_v6, %v40_v3 }
  0x1f   :  { %v42_v8 = vrot.slane %v37_v7, %v41_v4  ;;  %v46_v9 = vrot.slane %v37_v7, %v45_v5  ;;  %p125_p13 = por %p124_p12, %p123_p11 }
  0x21   :  { %v47_v11 = vcombine.low %v42_v8, %v46_v9  ;;  %p126_p0 = pnand %p125_p13, %p119_p10 }
  0x23   :  { %v54_v13 = vrot.slane %v47_v11, %v53_v10 }
  0x25   :  { %v56_v14 = vadd.f32 %v54_v13, %v36_v12 }
  0x27   :  { %57 = vst [vmem:[#allocation7] sm:$0xf] %v56_v14 }
  0x28   :  { %129 = shalt.err (!%p126_p0)
}
  0x29   :  { %67 = dma.vmem_to_hbm [thread:$0]  %s65_s19, 64, %s174_s2, [#allocation4]  }
  0x2a   :  { %142 = dma.done.wait [#allocation4], 64  }
  0x2b   :  { %143 = vsyncadd [#allocation4], 4294967232 }
  0x2c   :  { %71 = vsyncpa [#allocation3], 1 }
  0x2d   :  { %72 = vsyncpa [#allocation6], 1 }
  0x2e   :  { %73 = vsyncpa [#allocation4], 1 }

</bundles_post_ra>
